<compile_context>
chip_gen: v5e
topology: v5e:2x2
jax: 0.10.0
libtpu: 0.0.40
codegen_flags: <defaults>
</compile_context>

<pallas_src>
import functools

import jax
import jax.numpy as jnp
from jax.experimental import pallas as pl
from jax.experimental.pallas import tpu as pltpu


# ---------------------------------------------------------------------------
# Kernel
# ---------------------------------------------------------------------------
def a2c_kernel(x_ref,
               w1_ref, b1_ref,
               w2_ref, b2_ref,
               w3_ref, b3_ref,
               wh_ref, bh_ref,
               out_ref):
    # x arrives already in bf16 (module's `fx = x.float()` -> bf16 MXU input);
    # every matmul accumulates in f32, bias adds / ReLU run in f32.
    h = x_ref[...]

    # fc: Linear -> ReLU -> Linear -> ReLU -> Linear -> ReLU
    h = jnp.dot(h, w1_ref[...], preferred_element_type=jnp.float32) + b1_ref[...]
    h = jnp.maximum(h, 0.0).astype(jnp.bfloat16)
    h = jnp.dot(h, w2_ref[...], preferred_element_type=jnp.float32) + b2_ref[...]
    h = jnp.maximum(h, 0.0).astype(jnp.bfloat16)
    h = jnp.dot(h, w3_ref[...], preferred_element_type=jnp.float32) + b3_ref[...]
    h = jnp.maximum(h, 0.0).astype(jnp.bfloat16)

    # Fused heads: columns [0:A) = policy, column A = value, rest zero-padding.
    # Single 128-lane-wide output -> unmasked, lane-dense stores.
    out_ref[...] = (
        jnp.dot(h, wh_ref[...], preferred_element_type=jnp.float32) + bh_ref[...]
    )


# ---------------------------------------------------------------------------
# Parameter packing (done once, amortized over many forward calls)
# ---------------------------------------------------------------------------
def _round_up(n, m):
    return ((n + m - 1) // m) * m


def _cdiv(a, b):
    return (a + b - 1) // b


def pack_params(params):
    """Pads/fuses/bf16-casts the PyTorch-style params for the kernel.

    params: [(w1,b1),(w2,b2),(w3,b3),(wp,bp),(wv,bv)], weights already transposed
            to (in_features, out_features), biases as (1, out_features).
    Returns (packed_tuple, n_actions).
    """
    (w1, b1), (w2, b2), (w3, b3), (wp, bp), (wv, bv) = params
    n_obs = w1.shape[0]
    n_actions = wp.shape[1]

    # Zero-pad the input-feature rows of w1 to a lane multiple; padding is inert
    # (padded rows are zero) and only forces an x pad when n_obs % 128 != 0.
    n_obs_p = max(128, _round_up(n_obs, 128))
    w1p = jnp.zeros((n_obs_p, w1.shape[1]), jnp.float32).at[:n_obs].set(w1)

    # Fuse policy + value into one zero-padded, lane-dense head.
    head_pad = max(128, _round_up(n_actions + 1, 128))
    wh = jnp.zeros((wp.shape[0], head_pad), jnp.float32)
    wh = wh.at[:, :n_actions].set(wp).at[:, n_actions:n_actions + 1].set(wv)
    bh = jnp.zeros((1, head_pad), jnp.float32)
    bh = bh.at[:, :n_actions].set(bp).at[:, n_actions:n_actions + 1].set(bv)

    bf16 = lambda a: a.astype(jnp.bfloat16)
    packed = (bf16(w1p), b1.astype(jnp.float32),
              bf16(w2), b2.astype(jnp.float32),
              bf16(w3), b3.astype(jnp.float32),
              bf16(wh), bh)
    return packed, n_actions


# ---------------------------------------------------------------------------
# Forward wrapper
# ---------------------------------------------------------------------------
@functools.partial(jax.jit, static_argnames=("n_actions", "batch_tile"))
def atari_a2c_forward(x, packed, n_actions, *, batch_tile=512):
    """x: (B, n_obs) any float/int dtype.  Returns (policy (B, A), value (B, 1)).

    batch_tile: max rows per grid step (multiple of 8).  512 is a good default
    on v6e/v7x; 256 is a reasonable choice on v5e.
    """
    assert batch_tile % 8 == 0, "batch_tile must be a multiple of 8 (sublanes)"
    w1, b1, w2, b2, w3, b3, wh, bh = packed
    B, n_obs = x.shape
    n_obs_p = w1.shape[0]
    head_pad = wh.shape[1]
    d1, d2, d3 = w1.shape[1], w2.shape[1], w3.shape[1]
    assert n_obs <= n_obs_p

    # Batch tile selection:
    #  * tiny batch (B <= 64): one sublane-aligned tile; splitting only adds
    #    per-step overhead (the RL-stepping case).
    #  * larger batch: at least 2 grid steps so the "parallel" axis actually
    #    shards across v7x's two TensorCores, capped at batch_tile rows.
    if B <= 64:
        tb = _round_up(max(B, 1), 8)
    else:
        tb = min(batch_tile, _round_up(_cdiv(B, 2), 8))
    B_p = _round_up(B, tb)

    # fx = x.float() -> bf16 (halves x DMA bytes; kernel accumulates in f32).
    xb = x.astype(jnp.bfloat16)
    # Pad only when actually needed; padding is inert (padded w1 rows are zero).
    if (B_p != B) or (n_obs_p != n_obs):
        xb = jnp.zeros((B_p, n_obs_p), jnp.bfloat16).at[:B, :n_obs].set(xb)

    grid = (B_p // tb,)
    const2 = lambda i: (0, 0)           # weights/biases: resident across grid steps
    batch_map = lambda i: (i, 0)        # x / out: tiled along batch

    flops = 2 * B_p * (n_obs_p * d1 + d1 * d2 + d2 * d3 + d3 * head_pad)
    in_arrays = (xb, w1, b1, w2, b2, w3, b3, wh, bh)
    bytes_accessed = int(sum(a.size * a.dtype.itemsize for a in in_arrays)
                         + B_p * head_pad * 4)

    out = pl.pallas_call(
        a2c_kernel,
        out_shape=jax.ShapeDtypeStruct((B_p, head_pad), jnp.float32),
        grid=grid,
        in_specs=[
            pl.BlockSpec((tb, n_obs_p), batch_map),
            pl.BlockSpec(tuple(w1.shape), const2),
            pl.BlockSpec(tuple(b1.shape), const2),
            pl.BlockSpec(tuple(w2.shape), const2),
            pl.BlockSpec(tuple(b2.shape), const2),
            pl.BlockSpec(tuple(w3.shape), const2),
            pl.BlockSpec(tuple(b3.shape), const2),
            pl.BlockSpec(tuple(wh.shape), const2),
            pl.BlockSpec(tuple(bh.shape), const2),
        ],
        out_specs=pl.BlockSpec((tb, head_pad), batch_map),
        compiler_params=pltpu.CompilerParams(
            dimension_semantics=("parallel",)),   # v7x: shard batch over 2 TCs
        cost_estimate=pl.CostEstimate(
            flops=int(flops), transcendentals=0, bytes_accessed=bytes_accessed),
    )(*in_arrays)

    policy = out[:B, :n_actions]
    value = out[:B, n_actions:n_actions + 1]
    return policy, value


# ---------------------------------------------------------------------------
# Param init + references
# ---------------------------------------------------------------------------
def init_params(key, n_obs, n_actions):
    """Deterministic synthetic params, shapes matching the PyTorch module.
    Weights stored already-transposed: (in_features, out_features)."""
    dims = [(n_obs, 256), (256, 256), (256, 512), (512, n_actions), (512, 1)]
    params = []
    for fan_in, fan_out in dims:
        key, kw, kb = jax.random.split(key, 3)
        scale = 1.0 / jnp.sqrt(jnp.float32(fan_in))
        w = jax.random.uniform(kw, (fan_in, fan_out), jnp.float32, -scale, scale)
        b = jax.random.uniform(kb, (1, fan_out), jnp.float32, -scale, scale)
        params.append((w, b))
    return params


def reference_forward_f32(x, params):
    """Pure-JAX all-f32 reference (exact original-module numerics)."""
    (w1, b1), (w2, b2), (w3, b3), (wp, bp), (wv, bv) = params
    h = jnp.maximum(x.astype(jnp.float32) @ w1 + b1, 0.0)
    h = jnp.maximum(h @ w2 + b2, 0.0)
    h = jnp.maximum(h @ w3 + b3, 0.0)
    return h @ wp + bp, h @ wv + bv


def reference_forward_mixed(x, params):
    """Pure-JAX reference of the kernel's exact mixed precision (bf16 dots, f32 acc)."""
    (w1, b1), (w2, b2), (w3, b3), (wp, bp), (wv, bv) = params
    bf = lambda a: a.astype(jnp.bfloat16)
    h = x.astype(jnp.float32)
    for w, b in ((w1, b1), (w2, b2), (w3, b3)):
        h = jnp.maximum(
            jnp.dot(bf(h), bf(w), preferred_element_type=jnp.float32) + b, 0.0)
    pol = jnp.dot(bf(h), bf(wp), preferred_element_type=jnp.float32) + bp
    val = jnp.dot(bf(h), bf(wv), preferred_element_type=jnp.float32) + bv
    return pol, val


# ---------------------------------------------------------------------------
if __name__ == "__main__":
    B, n_obs, n_actions = 8, 128, 8

    key = jax.random.PRNGKey(0)
    key, kx = jax.random.split(key)
    x = jax.random.normal(kx, (B, n_obs), jnp.float32)
    params = init_params(key, n_obs, n_actions)

    packed, n_act = pack_params(params)

    # --- small-batch (RL stepping) path: single tile, no padding, grid=(1,) ---
    policy, value = atari_a2c_forward(x, packed, n_act)
    jax.block_until_ready((policy, value))
    assert policy.shape == (B, n_actions) and value.shape == (B, 1)

    # Exact-precision check against a pure-JAX replica of the kernel's numerics.
    p_mx, v_mx = reference_forward_mixed(x, params)
    assert jnp.allclose(policy, p_mx, atol=1e-3, rtol=1e-3)
    assert jnp.allclose(value, v_mx, atol=1e-3, rtol=1e-3)

    # Fidelity check against the original all-f32 module semantics
    # (bf16-weight quantization error only).
    p_f32, v_f32 = reference_forward_f32(x, params)
    assert jnp.allclose(policy, p_f32, atol=5e-2, rtol=5e-2)
    assert jnp.allclose(value, v_f32, atol=5e-2, rtol=5e-2)

    # --- larger batch: exercises batch padding + multi-step "parallel" grid ---
    B2 = 320
    key, kx2 = jax.random.split(key)
    x2 = jax.random.normal(kx2, (B2, n_obs), jnp.float32)
    p2, v2 = atari_a2c_forward(x2, packed, n_act)
    jax.block_until_ready((p2, v2))
    assert p2.shape == (B2, n_actions) and v2.shape == (B2, 1)
    p2_mx, v2_mx = reference_forward_mixed(x2, params)
    assert jnp.allclose(p2, p2_mx, atol=1e-3, rtol=1e-3)
    assert jnp.allclose(v2, v2_mx, atol=1e-3, rtol=1e-3)

    print("KERNEL_OK")
</pallas_src>

<mosaic_0001>
module attributes {stable_mosaic.version = 11 : i64} {
  func.func @a2c_kernel(%arg0: i32, %arg1: memref<8x128xbf16, #tpu.memory_space<vmem>>, %arg2: memref<128x256xbf16, #tpu.memory_space<vmem>>, %arg3: memref<1x256xf32, #tpu.memory_space<vmem>>, %arg4: memref<256x256xbf16, #tpu.memory_space<vmem>>, %arg5: memref<1x256xf32, #tpu.memory_space<vmem>>, %arg6: memref<256x512xbf16, #tpu.memory_space<vmem>>, %arg7: memref<1x512xf32, #tpu.memory_space<vmem>>, %arg8: memref<512x128xbf16, #tpu.memory_space<vmem>>, %arg9: memref<1x128xf32, #tpu.memory_space<vmem>>, %arg10: memref<8x128xf32, #tpu.memory_space<vmem>>) attributes {dimension_semantics = [#tpu.dimension_semantics<parallel>], iteration_bounds = array<i64: 1>, scalar_prefetch = 0 : i64, scratch_operands = 0 : i64, tpu.core_type = #tpu.core_type<tc>, window_params = [{transform_indices = @transform_0, window_bounds = array<i64: 8, 128>}, {pipeline_mode = #tpu.pipeline_mode<synchronous>, transform_indices = @transform_1, window_bounds = array<i64: 128, 256>}, {pipeline_mode = #tpu.pipeline_mode<synchronous>, transform_indices = @transform_2, window_bounds = array<i64: 1, 256>}, {pipeline_mode = #tpu.pipeline_mode<synchronous>, transform_indices = @transform_3, window_bounds = array<i64: 256, 256>}, {pipeline_mode = #tpu.pipeline_mode<synchronous>, transform_indices = @transform_4, window_bounds = array<i64: 1, 256>}, {pipeline_mode = #tpu.pipeline_mode<synchronous>, transform_indices = @transform_5, window_bounds = array<i64: 256, 512>}, {pipeline_mode = #tpu.pipeline_mode<synchronous>, transform_indices = @transform_6, window_bounds = array<i64: 1, 512>}, {pipeline_mode = #tpu.pipeline_mode<synchronous>, transform_indices = @transform_7, window_bounds = array<i64: 512, 128>}, {pipeline_mode = #tpu.pipeline_mode<synchronous>, transform_indices = @transform_8, window_bounds = array<i64: 1, 128>}, {transform_indices = @transform_9, window_bounds = array<i64: 8, 128>}]} {
    %c0 = arith.constant 0 : index
    %c0_0 = arith.constant 0 : index
    %0 = vector.load %arg1[%c0, %c0_0] : memref<8x128xbf16, #tpu.memory_space<vmem>>, vector<8x128xbf16>
    %c0_1 = arith.constant 0 : index
    %c0_2 = arith.constant 0 : index
    %1 = vector.load %arg2[%c0_1, %c0_2] : memref<128x256xbf16, #tpu.memory_space<vmem>>, vector<128x256xbf16>
    %cst = arith.constant dense<0.000000e+00> : vector<8x256xf32>
    %2 = tpu.matmul %0, %1, %cst {dimension_numbers = #tpu.dot_dimension_numbers<[1], [0], [0], [1], [0, 0, 1, 1], [], []>} : vector<8x128xbf16>, vector<128x256xbf16>, vector<8x256xf32> -> vector<8x256xf32>
    %c0_3 = arith.constant 0 : index
    %c0_4 = arith.constant 0 : index
    %3 = vector.load %arg3[%c0_3, %c0_4] : memref<1x256xf32, #tpu.memory_space<vmem>>, vector<1x256xf32>
    %4 = vector.broadcast %3 : vector<1x256xf32> to vector<8x256xf32>
    %5 = arith.addf %2, %4 : vector<8x256xf32>
    %cst_5 = arith.constant 0.000000e+00 : f32
    %6 = vector.broadcast %cst_5 : f32 to vector<8x256xf32>
    %7 = arith.maximumf %5, %6 : vector<8x256xf32>
    %8 = arith.truncf %7 : vector<8x256xf32> to vector<8x256xbf16>
    %c0_6 = arith.constant 0 : index
    %c0_7 = arith.constant 0 : index
    %9 = vector.load %arg4[%c0_6, %c0_7] : memref<256x256xbf16, #tpu.memory_space<vmem>>, vector<256x256xbf16>
    %cst_8 = arith.constant dense<0.000000e+00> : vector<8x256xf32>
    %10 = tpu.matmul %8, %9, %cst_8 {dimension_numbers = #tpu.dot_dimension_numbers<[1], [0], [0], [1], [0, 0, 1, 1], [], []>} : vector<8x256xbf16>, vector<256x256xbf16>, vector<8x256xf32> -> vector<8x256xf32>
    %c0_9 = arith.constant 0 : index
    %c0_10 = arith.constant 0 : index
    %11 = vector.load %arg5[%c0_9, %c0_10] : memref<1x256xf32, #tpu.memory_space<vmem>>, vector<1x256xf32>
    %12 = vector.broadcast %11 : vector<1x256xf32> to vector<8x256xf32>
    %13 = arith.addf %10, %12 : vector<8x256xf32>
    %cst_11 = arith.constant 0.000000e+00 : f32
    %14 = vector.broadcast %cst_11 : f32 to vector<8x256xf32>
    %15 = arith.maximumf %13, %14 : vector<8x256xf32>
    %16 = arith.truncf %15 : vector<8x256xf32> to vector<8x256xbf16>
    %c0_12 = arith.constant 0 : index
    %c0_13 = arith.constant 0 : index
    %17 = vector.load %arg6[%c0_12, %c0_13] : memref<256x512xbf16, #tpu.memory_space<vmem>>, vector<256x512xbf16>
    %cst_14 = arith.constant dense<0.000000e+00> : vector<8x512xf32>
    %18 = tpu.matmul %16, %17, %cst_14 {dimension_numbers = #tpu.dot_dimension_numbers<[1], [0], [0], [1], [0, 0, 1, 1], [], []>} : vector<8x256xbf16>, vector<256x512xbf16>, vector<8x512xf32> -> vector<8x512xf32>
    %c0_15 = arith.constant 0 : index
    %c0_16 = arith.constant 0 : index
    %19 = vector.load %arg7[%c0_15, %c0_16] : memref<1x512xf32, #tpu.memory_space<vmem>>, vector<1x512xf32>
    %20 = vector.broadcast %19 : vector<1x512xf32> to vector<8x512xf32>
    %21 = arith.addf %18, %20 : vector<8x512xf32>
    %cst_17 = arith.constant 0.000000e+00 : f32
    %22 = vector.broadcast %cst_17 : f32 to vector<8x512xf32>
    %23 = arith.maximumf %21, %22 : vector<8x512xf32>
    %24 = arith.truncf %23 : vector<8x512xf32> to vector<8x512xbf16>
    %c0_18 = arith.constant 0 : index
    %c0_19 = arith.constant 0 : index
    %25 = vector.load %arg8[%c0_18, %c0_19] : memref<512x128xbf16, #tpu.memory_space<vmem>>, vector<512x128xbf16>
    %cst_20 = arith.constant dense<0.000000e+00> : vector<8x128xf32>
    %26 = tpu.matmul %24, %25, %cst_20 {dimension_numbers = #tpu.dot_dimension_numbers<[1], [0], [0], [1], [0, 0, 1, 1], [], []>} : vector<8x512xbf16>, vector<512x128xbf16>, vector<8x128xf32> -> vector<8x128xf32>
    %c0_21 = arith.constant 0 : index
    %c0_22 = arith.constant 0 : index
    %27 = vector.load %arg9[%c0_21, %c0_22] : memref<1x128xf32, #tpu.memory_space<vmem>>, vector<1x128xf32>
    %28 = vector.broadcast %27 : vector<1x128xf32> to vector<8x128xf32>
    %29 = arith.addf %26, %28 : vector<8x128xf32>
    %c0_23 = arith.constant 0 : index
    %c0_24 = arith.constant 0 : index
    %30 = vector.load %arg10[%c0_23, %c0_24] : memref<8x128xf32, #tpu.memory_space<vmem>>, vector<8x128xf32>
    tpu.vector_store %arg10[%c0_23, %c0_24], %29 {strides = array<i32>} : memref<8x128xf32, #tpu.memory_space<vmem>>, vector<8x128xf32>,
    return
  }
  func.func @transform_0(%arg0: i32) -> (i32, i32) {
    %c0_i32 = arith.constant 0 : i32
    %c0_i32_0 = arith.constant 0 : i32
    return %arg0, %c0_i32 : i32, i32
  }
  func.func @transform_1(%arg0: i32) -> (i32, i32) {
    %c0_i32 = arith.constant 0 : i32
    %c0_i32_0 = arith.constant 0 : i32
    %c0_i32_1 = arith.constant 0 : i32
    return %c0_i32, %c0_i32_0 : i32, i32
  }
  func.func @transform_2(%arg0: i32) -> (i32, i32) {
    %c0_i32 = arith.constant 0 : i32
    %c0_i32_0 = arith.constant 0 : i32
    %c0_i32_1 = arith.constant 0 : i32
    return %c0_i32, %c0_i32_0 : i32, i32
  }
  func.func @transform_3(%arg0: i32) -> (i32, i32) {
    %c0_i32 = arith.constant 0 : i32
    %c0_i32_0 = arith.constant 0 : i32
    %c0_i32_1 = arith.constant 0 : i32
    return %c0_i32, %c0_i32_0 : i32, i32
  }
  func.func @transform_4(%arg0: i32) -> (i32, i32) {
    %c0_i32 = arith.constant 0 : i32
    %c0_i32_0 = arith.constant 0 : i32
    %c0_i32_1 = arith.constant 0 : i32
    return %c0_i32, %c0_i32_0 : i32, i32
  }
  func.func @transform_5(%arg0: i32) -> (i32, i32) {
    %c0_i32 = arith.constant 0 : i32
    %c0_i32_0 = arith.constant 0 : i32
    %c0_i32_1 = arith.constant 0 : i32
    return %c0_i32, %c0_i32_0 : i32, i32
  }
  func.func @transform_6(%arg0: i32) -> (i32, i32) {
    %c0_i32 = arith.constant 0 : i32
    %c0_i32_0 = arith.constant 0 : i32
    %c0_i32_1 = arith.constant 0 : i32
    return %c0_i32, %c0_i32_0 : i32, i32
  }
  func.func @transform_7(%arg0: i32) -> (i32, i32) {
    %c0_i32 = arith.constant 0 : i32
    %c0_i32_0 = arith.constant 0 : i32
    %c0_i32_1 = arith.constant 0 : i32
    return %c0_i32, %c0_i32_0 : i32, i32
  }
  func.func @transform_8(%arg0: i32) -> (i32, i32) {
    %c0_i32 = arith.constant 0 : i32
    %c0_i32_0 = arith.constant 0 : i32
    %c0_i32_1 = arith.constant 0 : i32
    return %c0_i32, %c0_i32_0 : i32, i32
  }
  func.func @transform_9(%arg0: i32) -> (i32, i32) {
    %c0_i32 = arith.constant 0 : i32
    %c0_i32_0 = arith.constant 0 : i32
    return %arg0, %c0_i32 : i32, i32
  }
}

</mosaic_0001>

<bundles_post_ra>
// kernel: atari_a2c_forward.1
= control target key start
LH: loop header
LB: loop body
LE: loop exit
PB: predicated region body
PF: predicated region fallthrough
CT: control target
= control target key end

     0   :  { %14 = vsyncpa [#allocation3], 0  ;;  %s2231_s0 = inlined_call_operand.vmem [shape: bf16[8,128], index: 0, kind: input, shape index: {}]   ;;  %s2232_s1 = inlined_call_operand.hbm [shape: bf16[128,256], index: 1, kind: input, shape index: {}]   ;;  %s2233_s2 = inlined_call_operand.vmem [shape: f32[1,256], index: 2, kind: input, shape index: {}]   ;;  %s2234_s3 = inlined_call_operand.hbm [shape: bf16[256,256], index: 3, kind: input, shape index: {}]   ;;  %s2235_s4 = inlined_call_operand.vmem [shape: f32[1,256], index: 4, kind: input, shape index: {}]   ;;  %s2236_s5 = inlined_call_operand.hbm [shape: bf16[256,512], index: 5, kind: input, shape index: {}]   ;;  %s2237_s6 = inlined_call_operand.vmem [shape: f32[1,512], index: 6, kind: input, shape index: {}]   ;;  %s2238_s7 = inlined_call_operand.hbm [shape: bf16[512,128], index: 7, kind: input, shape index: {}]   ;;  %s2239_s8 = inlined_call_operand.vmem [shape: f32[1,128], index: 8, kind: input, shape index: {}]   ;;  %s2240_s9 = inlined_call_operand.vmem [shape: f32[8,128], index: 9, kind: output, shape index: {}]  }
   0x1   :  { %15 = vsyncpa [#allocation5], 0 }
   0x2   :  { %16 = vsyncpa [#allocation8], 0  ;;  %s38_s11 = sshll.u32 %s2234_s3, 4  ;;  %s2141_s12 = smov [#allocation4]   ;;  %s39_s11 = int_to_ptr.hbm [resolvable:$true] %s38_s11 }
   0x3   :  { %s40_s13 = sshll.u32 %s2141_s12, 4  ;;  %s23_s16 = sshll.u32 %s2232_s1, 4  ;;  %s41_s13 = int_to_ptr.vmem [resolvable:$true] %s40_s13  ;;  %s24_s16 = int_to_ptr.hbm [resolvable:$true] %s23_s16 }
   0x4   :  { %s2142_s17 = smov 128   ;;  %s2143_s18 = smov 8  }
   0x5   :  { %46 = dma.hbm_to_vmem [thread:$0]  %s39_s11, 4096, %s41_s13, [#allocation5], %s2142_s17, %s2142_s17, %s2143_s18  }
   0x6   :  { %s2144_s19 = smov [#allocation2]   ;;  %s53_s23 = sshll.u32 %s2236_s5, 4  ;;  %s54_s23 = int_to_ptr.hbm [resolvable:$true] %s53_s23 }
   0x7   :  { %s25_s20 = sshll.u32 %s2144_s19, 4  ;;  %s2145_s3 = smov [#allocation6]   ;;  %s26_s20 = int_to_ptr.vmem [resolvable:$true] %s25_s20 }
   0x8   :  { %31 = dma.hbm_to_vmem [thread:$0]  %s24_s16, 2048, %s26_s20, [#allocation3], %s2142_s17, %s2142_s17, %s2143_s18  }
   0x9   :  { %s55_s24 = sshll.u32 %s2145_s3, 4  ;;  %s68_s1 = sshll.u32 %s2238_s7, 4  ;;  %s56_s24 = int_to_ptr.vmem [resolvable:$true] %s55_s24  ;;  %s69_s1 = int_to_ptr.hbm [resolvable:$true] %s68_s1 }
   0xa   :  { %s2146_s27 = smov 256   ;;  %s2147_s28 = smov 16  }
   0xb   :  { %61 = dma.hbm_to_vmem [thread:$0]  %s54_s23, 8192, %s56_s24, [#allocation5], %s2146_s27, %s2146_s27, %s2147_s28  }
   0xc   :  { %s2148_s29 = smov [#allocation7]   ;;  %s2149_s10 = smov 64  }
   0xd   :  { %s70_s30 = sshll.u32 %s2148_s29, 4  ;;  %s2150_s11 = smov 4   ;;  %s71_s30 = int_to_ptr.vmem [resolvable:$true] %s70_s30 }
   0xe   :  { %76 = dma.hbm_to_vmem [thread:$0]  %s69_s1, 4096, %s71_s30, [#allocation8], %s2149_s10, %s2149_s10, %s2150_s11  }
   0xf   :  { %2135 = dma.done.wait [#allocation3], 2048  }
  0x10   :  { %2136 = vsyncadd [#allocation3], 4294965248 }
  0x11   :  { %2137 = dma.done.wait [#allocation5], 12288  }
  0x12   :  { %2138 = vsyncadd [#allocation5], 4294955008 }
  0x13   :  { %2139 = dma.done.wait [#allocation8], 4096  }
  0x14   :  { %2140 = vsyncadd [#allocation8], 4294963200  ;;  %v1366_v0 = vld [vmem:[#allocation2 + $0x70] sm:$0xf]  ;;  %v1899_v1 = vld [vmem:[#allocation2 + $0x74] sm:$0xf0] }
  0x15   :  { %v1898_v2 = vld [vmem:[#allocation2 + $0x74] sm:$0xf]  ;;  %v1367_v3 = vor.u32 %v1899_v1, %v1366_v0  ;;  %v1368_v4 = vld [vmem:[#allocation2 + $0x78] sm:$0xf0]  ;;  %v1358_v5 = vld [vmem:[#allocation2 + $0x60] sm:$0xf] }
  0x16   :  { %v1897_v6 = vld [vmem:[#allocation2 + $0x64] sm:$0xf0]  ;;  %v1371_v7 = vor.u32 %v1898_v2, %v1368_v4  ;;  %v1896_v8 = vld [vmem:[#allocation2 + $0x64] sm:$0xf]  ;;  %v1360_v9 = vld [vmem:[#allocation2 + $0x68] sm:$0xf0] }
  0x17   :  { %198 = vmatpush.bf16.msra.mxu0 %v1367_v3  ;;  %v1359_v10 = vor.u32 %v1897_v6, %v1358_v5  ;;  %v1363_v11 = vor.u32 %v1896_v8, %v1360_v9  ;;  %v1350_v12 = vld [vmem:[#allocation2 + $0x50] sm:$0xf]  ;;  %v1895_v13 = vld [vmem:[#allocation2 + $0x54] sm:$0xf0]  ;;  %v1894_v14 = vld [vmem:[#allocation2 + $0x54] sm:$0xf] }
  0x18   :  { %211 = vmatpush.bf16.msra.mxu1 %v1371_v7  ;;  %v1352_v15 = vld [vmem:[#allocation2 + $0x58] sm:$0xf0]  ;;  %v1351_v16 = vor.u32 %v1895_v13, %v1350_v12  ;;  %v1342_v18 = vld [vmem:[#allocation2 + $0x40] sm:$0xf]  ;;  %v1893_v19 = vld [vmem:[#allocation2 + $0x44] sm:$0xf0] }
  0x19   :  { %v1355_v17 = vor.u32 %v1894_v14, %v1352_v15  ;;  %v1892_v20 = vld [vmem:[#allocation2 + $0x44] sm:$0xf]  ;;  %v1344_v21 = vld [vmem:[#allocation2 + $0x48] sm:$0xf0]  ;;  %v1343_v22 = vor.u32 %v1893_v19, %v1342_v18  ;;  %v1430_v23 = vld [vmem:[#allocation4 + $0x70] sm:$0xf] }
  0x1a   :  { %v1915_v24 = vld [vmem:[#allocation4 + $0x74] sm:$0xf0]  ;;  %v1494_v25 = vld [vmem:[#allocation4 + $0xf0] sm:$0xf]  ;;  %v1347_v26 = vor.u32 %v1892_v20, %v1344_v21  ;;  %v1890_v31 = vld [vmem:[#allocation2 + $0x34] sm:$0xf] }
  0x1b   :  { %199 = vmatpush.bf16.msra.mxu0 %v1359_v10  ;;  %v1334_v27 = vld [vmem:[#allocation2 + $0x30] sm:$0xf]  ;;  %v1891_v28 = vld [vmem:[#allocation2 + $0x34] sm:$0xf0]  ;;  %v1431_v29 = vor.u32 %v1915_v24, %v1430_v23  ;;  %v1336_v32 = vld [vmem:[#allocation2 + $0x38] sm:$0xf0] }
  0x1c   :  { %212 = vmatpush.bf16.msra.mxu1 %v1363_v11  ;;  %v1931_v30 = vld [vmem:[#allocation4 + $0xf4] sm:$0xf0]  ;;  %v1422_v34 = vld [vmem:[#allocation4 + $0x60] sm:$0xf]  ;;  %v1913_v35 = vld [vmem:[#allocation4 + $0x64] sm:$0xf0]  ;;  %v1335_v38 = vor.u32 %v1891_v28, %v1334_v27  ;;  %v1339_v43 = vor.u32 %v1890_v31, %v1336_v32 }
  0x1d   :  { %v1495_v33 = vor.u32 %v1931_v30, %v1494_v25  ;;  %426 = vmatpush.bf16.msra.mxu2 %v1431_v29  ;;  %v1486_v36 = vld [vmem:[#allocation4 + $0xe0] sm:$0xf]  ;;  %v1929_v37 = vld [vmem:[#allocation4 + $0xe4] sm:$0xf0]  ;;  %v1423_v41 = vor.u32 %v1913_v35, %v1422_v34  ;;  %v1888_v44 = vld [vmem:[#allocation2 + $0x24] sm:$0xf] }
  0x1e   :  { %v1326_v39 = vld [vmem:[#allocation2 + $0x20] sm:$0xf]  ;;  %v1889_v40 = vld [vmem:[#allocation2 + $0x24] sm:$0xf0]  ;;  %v1487_v42 = vor.u32 %v1929_v37, %v1486_v36  ;;  %v1414_v45 = vld [vmem:[#allocation4 + $0x50] sm:$0xf] }
  0x1f   :  { %200 = vmatpush.bf16.msra.mxu0 %v1351_v16  ;;  %439 = vmatpush.bf16.msra.mxu3 %v1495_v33  ;;  %v1911_v46 = vld [vmem:[#allocation4 + $0x54] sm:$0xf0]  ;;  %v1328_v47 = vld [vmem:[#allocation2 + $0x28] sm:$0xf0]  ;;  %v1478_v48 = vld [vmem:[#allocation4 + $0xd0] sm:$0xf]  ;;  %v1327_v51 = vor.u32 %v1889_v40, %v1326_v39 }
  0x20   :  { %213 = vmatpush.bf16.msra.mxu1 %v1355_v17  ;;  %v1927_v49 = vld [vmem:[#allocation4 + $0xd4] sm:$0xf0]  ;;  %v1415_v50 = vor.u32 %v1911_v46, %v1414_v45  ;;  %v1318_v52 = vld [vmem:[#allocation2 + $0x10] sm:$0xf]  ;;  %v1406_v54 = vld [vmem:[#allocation4 + $0x40] sm:$0xf]  ;;  %v1331_v56 = vor.u32 %v1888_v44, %v1328_v47 }
  0x21   :  { %427 = vmatpush.bf16.msra.mxu2 %v1423_v41  ;;  %v1479_v53 = vor.u32 %v1927_v49, %v1478_v48  ;;  %v1909_v55 = vld [vmem:[#allocation4 + $0x44] sm:$0xf0]  ;;  %v1887_v57 = vld [vmem:[#allocation2 + $0x14] sm:$0xf0]  ;;  %v1470_v58 = vld [vmem:[#allocation4 + $0xc0] sm:$0xf] }
  0x22   :  { %v1925_v59 = vld [vmem:[#allocation4 + $0xc4] sm:$0xf0]  ;;  %v1886_v60 = vld [vmem:[#allocation2 + $0x14] sm:$0xf]  ;;  %v1320_v61 = vld [vmem:[#allocation2 + $0x18] sm:$0xf0]  ;;  %v1407_v63 = vor.u32 %v1909_v55, %v1406_v54  ;;  %v1319_v0 = vor.u32 %v1887_v57, %v1318_v52 }
  0x23   :  { %201 = vmatpush.bf16.msra.mxu0 %v1343_v22  ;;  %440 = vmatpush.bf16.msra.mxu3 %v1487_v42  ;;  %v1310_v62 = vld [vmem:[#allocation2] sm:$0xf]  ;;  %v1885_v1 = vld [vmem:[#allocation2 + $0x4] sm:$0xf0]  ;;  %v1471_v2 = vor.u32 %v1925_v59, %v1470_v58  ;;  %v1398_v3 = vld [vmem:[#allocation4 + $0x30] sm:$0xf]  ;;  %v1323_v5 = vor.u32 %v1886_v60, %v1320_v61 }
  0x24   :  { %214 = vmatpush.bf16.msra.mxu1 %v1347_v26  ;;  %v1907_v4 = vld [vmem:[#allocation4 + $0x34] sm:$0xf0]  ;;  %v1884_v6 = vld [vmem:[#allocation2 + $0x4] sm:$0xf]  ;;  %v1462_v7 = vld [vmem:[#allocation4 + $0xb0] sm:$0xf]  ;;  %v1311_v15 = vor.u32 %v1885_v1, %v1310_v62 }
  0x25   :  { %428 = vmatpush.bf16.msra.mxu2 %v1415_v50  ;;  %v1923_v8 = vld [vmem:[#allocation4 + $0xb4] sm:$0xf0]  ;;  %v1312_v9 = vld [vmem:[#allocation2 + $0x8] sm:$0xf0]  ;;  %v1914_v10 = vld [vmem:[#allocation4 + $0x74] sm:$0xf]  ;;  %v1399_v14 = vor.u32 %v1907_v4, %v1398_v3 }
  0x26   :  { %v1432_v11 = vld [vmem:[#allocation4 + $0x78] sm:$0xf0]  ;;  %v1930_v12 = vld [vmem:[#allocation4 + $0xf4] sm:$0xf]  ;;  %v1463_v16 = vor.u32 %v1923_v8, %v1462_v7  ;;  %v1390_v17 = vld [vmem:[#allocation4 + $0x20] sm:$0xf]  ;;  %v1315_v19 = vor.u32 %v1884_v6, %v1312_v9 }
  0x27   :  { %202 = vmatpush.bf16.msra.mxu0 %v1335_v38  ;;  %441 = vmatpush.bf16.msra.mxu3 %v1479_v53  ;;  %v1496_v13 = vld [vmem:[#allocation4 + $0xf8] sm:$0xf0]  ;;  %v1905_v18 = vld [vmem:[#allocation4 + $0x24] sm:$0xf0]  ;;  %v1435_v20 = vor.u32 %v1914_v10, %v1432_v11  ;;  %v1454_v21 = vld [vmem:[#allocation4 + $0xa0] sm:$0xf] }
  0x28   :  { %215 = vmatpush.bf16.msra.mxu1 %v1339_v43  ;;  %v1921_v22 = vld [vmem:[#allocation4 + $0xa4] sm:$0xf0]  ;;  %v1499_v23 = vor.u32 %v1930_v12, %v1496_v13  ;;  %v1912_v24 = vld [vmem:[#allocation4 + $0x64] sm:$0xf]  ;;  %v1424_v25 = vld [vmem:[#allocation4 + $0x68] sm:$0xf0]  ;;  %v1391_v28 = vor.u32 %v1905_v18, %v1390_v17 }
  0x29   :  { %429 = vmatpush.bf16.msra.mxu2 %v1407_v63  ;;  %v1928_v26 = vld [vmem:[#allocation4 + $0xe4] sm:$0xf]  ;;  %v1488_v27 = vld [vmem:[#allocation4 + $0xe8] sm:$0xf0]  ;;  %v95_v29 = vld [vmem:[%s2231_s0] sm:$0xf]  ;;  %v1455_v30 = vor.u32 %v1921_v22, %v1454_v21  ;;  %v1427_v31 = vor.u32 %v1912_v24, %v1424_v25 }
  0x2a   :  { %v1491_v32 = vor.u32 %v1928_v26, %v1488_v27  ;;  %v1910_v33 = vld [vmem:[#allocation4 + $0x54] sm:$0xf]  ;;  %v1416_v34 = vld [vmem:[#allocation4 + $0x58] sm:$0xf0]  ;;  %v1908_v39 = vld [vmem:[#allocation4 + $0x44] sm:$0xf] }
  0x2b   :  { %203 = vmatpush.bf16.msra.mxu0 %v1327_v51  ;;  %442 = vmatpush.bf16.msra.mxu3 %v1471_v2  ;;  %v1926_v35 = vld [vmem:[#allocation4 + $0xd4] sm:$0xf]  ;;  %v1480_v36 = vld [vmem:[#allocation4 + $0xd8] sm:$0xf0]  ;;  %v1419_v37 = vor.u32 %v1910_v33, %v1416_v34  ;;  %v1408_v40 = vld [vmem:[#allocation4 + $0x48] sm:$0xf0] }
  0x2c   :  { %216 = vmatpush.bf16.msra.mxu1 %v1331_v56  ;;  %v1483_v38 = vor.u32 %v1926_v35, %v1480_v36  ;;  %v1924_v41 = vld [vmem:[#allocation4 + $0xc4] sm:$0xf]  ;;  %v1472_v42 = vld [vmem:[#allocation4 + $0xc8] sm:$0xf0]  ;;  %v1411_v43 = vor.u32 %v1908_v39, %v1408_v40  ;;  %v1906_v45 = vld [vmem:[#allocation4 + $0x34] sm:$0xf] }
  0x2d   :  { %430 = vmatpush.bf16.msra.mxu2 %v1399_v14  ;;  %v1475_v44 = vor.u32 %v1924_v41, %v1472_v42  ;;  %v1400_v46 = vld [vmem:[#allocation4 + $0x38] sm:$0xf0]  ;;  %v1922_v47 = vld [vmem:[#allocation4 + $0xb4] sm:$0xf]  ;;  %v1904_v51 = vld [vmem:[#allocation4 + $0x24] sm:$0xf] }
  0x2e   :  { %v1464_v48 = vld [vmem:[#allocation4 + $0xb8] sm:$0xf0]  ;;  %v1403_v49 = vor.u32 %v1906_v45, %v1400_v46  ;;  %v1392_v52 = vld [vmem:[#allocation4 + $0x28] sm:$0xf0]  ;;  %v1920_v53 = vld [vmem:[#allocation4 + $0xa4] sm:$0xf] }
  0x2f   :  { %204 = vmatpush.bf16.msra.mxu0 %v1319_v0  ;;  %443 = vmatpush.bf16.msra.mxu3 %v1463_v16  ;;  %v1467_v50 = vor.u32 %v1922_v47, %v1464_v48  ;;  %v1456_v54 = vld [vmem:[#allocation4 + $0xa8] sm:$0xf0]  ;;  %v1395_v55 = vor.u32 %v1904_v51, %v1392_v52  ;;  %v1382_v57 = vld [vmem:[#allocation4 + $0x10] sm:$0xf]  ;;  %v1903_v58 = vld [vmem:[#allocation4 + $0x14] sm:$0xf0] }
  0x30   :  { %217 = vmatpush.bf16.msra.mxu1 %v1323_v5  ;;  %v1459_v56 = vor.u32 %v1920_v53, %v1456_v54  ;;  %v1446_v59 = vld [vmem:[#allocation4 + $0x90] sm:$0xf]  ;;  %v1383_v60 = vor.u32 %v1903_v58, %v1382_v57  ;;  %v1919_v61 = vld [vmem:[#allocation4 + $0x94] sm:$0xf0]  ;;  %v1902_v62 = vld [vmem:[#allocation4 + $0x14] sm:$0xf] }
  0x31   :  { %431 = vmatpush.bf16.msra.mxu2 %v1391_v28  ;;  %v1384_v63 = vld [vmem:[#allocation4 + $0x18] sm:$0xf0]  ;;  %v1447_v0 = vor.u32 %v1919_v61, %v1446_v59  ;;  %v1918_v2 = vld [vmem:[#allocation4 + $0x94] sm:$0xf]  ;;  %v1374_v5 = vld [vmem:[#allocation4] sm:$0xf] }
  0x32   :  { %v1387_v1 = vor.u32 %v1902_v62, %v1384_v63  ;;  %v1448_v3 = vld [vmem:[#allocation4 + $0x98] sm:$0xf0]  ;;  %v1901_v6 = vld [vmem:[#allocation4 + $0x4] sm:$0xf0]  ;;  %v1438_v7 = vld [vmem:[#allocation4 + $0x80] sm:$0xf] }
  0x33   :  { %205 = vmatpush.bf16.msra.mxu0 %v1311_v15  ;;  %444 = vmatpush.bf16.msra.mxu3 %v1455_v30  ;;  %v1451_v4 = vor.u32 %v1918_v2, %v1448_v3  ;;  %v1375_v8 = vor.u32 %v1901_v6, %v1374_v5  ;;  %v1917_v9 = vld [vmem:[#allocation4 + $0x84] sm:$0xf0]  ;;  %v1900_v10 = vld [vmem:[#allocation4 + $0x4] sm:$0xf]  ;;  %v1376_v11 = vld [vmem:[#allocation4 + $0x8] sm:$0xf0] }
  0x34   :  { %218 = vmatpush.bf16.msra.mxu1 %v1315_v19  ;;  %v1439_v12 = vor.u32 %v1917_v9, %v1438_v7  ;;  %v1379_v13 = vor.u32 %v1900_v10, %v1376_v11  ;;  %v1916_v14 = vld [vmem:[#allocation4 + $0x84] sm:$0xf]  ;;  %v1440_v15 = vld [vmem:[#allocation4 + $0x88] sm:$0xf0]  ;;  %v1742_v17 = vld [vmem:[#allocation6 + $0x1e0] sm:$0xf] }
  0x35   :  { %432 = vmatpush.bf16.msra.mxu2 %v1383_v60  ;;  %v1443_v16 = vor.u32 %v1916_v14, %v1440_v15  ;;  %v1994_v18 = vld [vmem:[#allocation6 + $0x1ec] sm:$0xf0]  ;;  %v1992_v19 = vld [vmem:[#allocation6 + $0x1e4] sm:$0xf]  ;;  %v1744_v21 = vld [vmem:[#allocation6 + $0x1f0] sm:$0xf0] }
  0x36   :  { %206 = vmatmul.bf16.vlgmr.msra.gmra.mxu0 %v95_v29  ;;  %v1726_v22 = vld [vmem:[#allocation6 + $0x1c0] sm:$0xf]  ;;  %v1747_v24 = vor.u32 %v1992_v19, %v1744_v21  ;;  %v1988_v25 = vld [vmem:[#allocation6 + $0x1c4] sm:$0xf]  ;;  %v1728_v26 = vld [vmem:[#allocation6 + $0x1d0] sm:$0xf0] }
  0x37   :  { %452 = vmatpush.bf16.msrb.mxu0 %v1435_v20  ;;  %219 = vmatmul.bf16.vlgmr.msra.gmra.mxu1 %v95_v29  ;;  %v1743_v20 = vor.u32 %v1994_v18, %v1742_v17  ;;  %v1614_v27 = vld [vmem:[#allocation6 + $0xe0] sm:$0xf]  ;;  %v1962_v29 = vld [vmem:[#allocation6 + $0xec] sm:$0xf0]  ;;  %v1960_v30 = vld [vmem:[#allocation6 + $0xe4] sm:$0xf] }
  0x38   :  { %465 = vmatpush.bf16.msrb.mxu1 %v1499_v23  ;;  %445 = vmatpush.bf16.msra.mxu3 %v1447_v0  ;;  %v1990_v23 = vld [vmem:[#allocation6 + $0x1cc] sm:$0xf0]  ;;  %v1615_v33 = vor.u32 %v1962_v29, %v1614_v27  ;;  %v1710_v35 = vld [vmem:[#allocation6 + $0x1a0] sm:$0xf]  ;;  %v1956_v42 = vld [vmem:[#allocation6 + $0xc4] sm:$0xf] }
  0x39   :  { %433 = vmatpush.bf16.msra.mxu2 %v1375_v8  ;;  %v1727_v28 = vor.u32 %v1990_v23, %v1726_v22  ;;  %v1986_v36 = vld [vmem:[#allocation6 + $0x1ac] sm:$0xf0]  ;;  %v1598_v39 = vld [vmem:[#allocation6 + $0xc0] sm:$0xf]  ;;  %v1952_v51 = vld [vmem:[#allocation6 + $0xa4] sm:$0xf] }
  0x3a   :  { %v1958_v40 = vld [vmem:[#allocation6 + $0xcc] sm:$0xf0]  ;;  %v1694_v46 = vld [vmem:[#allocation6 + $0x180] sm:$0xf]  ;;  %v1980_v52 = vld [vmem:[#allocation6 + $0x184] sm:$0xf] }
  0x3b   :  { %453 = vmatpush.bf16.msrb.mxu0 %v1427_v31  ;;  %v1616_v31 = vld [vmem:[#allocation6 + $0xf0] sm:$0xf0]  ;;  %v1599_v41 = vor.u32 %v1958_v40, %v1598_v39  ;;  %v1982_v47 = vld [vmem:[#allocation6 + $0x18c] sm:$0xf0]  ;;  %v1566_v57 = vld [vmem:[#allocation6 + $0x80] sm:$0xf] }
  0x3c   :  { %466 = vmatpush.bf16.msrb.mxu1 %v1491_v32  ;;  %446 = vmatpush.bf16.msra.mxu3 %v1439_v12  ;;  %v1731_v32 = vor.u32 %v1988_v25, %v1728_v26  ;;  %v1619_v34 = vor.u32 %v1960_v30, %v1616_v31  ;;  %v1696_v53 = vld [vmem:[#allocation6 + $0x190] sm:$0xf0]  ;;  %v1695_v58 = vor.u32 %v1982_v47, %v1694_v46  ;;  %v1950_v59 = vld [vmem:[#allocation6 + $0x8c] sm:$0xf0]  ;;  %v1948_v60 = vld [vmem:[#allocation6 + $0x84] sm:$0xf] }
  0x3d   :  { %876 = vmatpush.bf16.msrb.mxu2 %v1615_v33  ;;  %v1584_v54 = vld [vmem:[#allocation6 + $0xb0] sm:$0xf0]  ;;  %v1699_v62 = vor.u32 %v1980_v52, %v1696_v53  ;;  %v1678_v63 = vld [vmem:[#allocation6 + $0x160] sm:$0xf]  ;;  %v1978_v0 = vld [vmem:[#allocation6 + $0x16c] sm:$0xf0]  ;;  %v1567_v3 = vor.u32 %v1950_v59, %v1566_v57 }
  0x3e   :  { %v1568_v61 = vld [vmem:[#allocation6 + $0x90] sm:$0xf0]  ;;  %v1550_v5 = vld [vmem:[#allocation6 + $0x60] sm:$0xf]  ;;  %v1679_v6 = vor.u32 %v1978_v0, %v1678_v63  ;;  %v1946_v7 = vld [vmem:[#allocation6 + $0x6c] sm:$0xf0] }
  0x3f   :  { %454 = vmatpush.bf16.msrb.mxu0 %v1419_v37  ;;  %v1984_v37 = vld [vmem:[#allocation6 + $0x1a4] sm:$0xf]  ;;  %v1680_v2 = vld [vmem:[#allocation6 + $0x170] sm:$0xf0]  ;;  %v1662_v11 = vld [vmem:[#allocation6 + $0x140] sm:$0xf] }
  0x40   :  { %467 = vmatpush.bf16.msrb.mxu1 %v1483_v38  ;;  %889 = vmatpush.bf16.msrb.mxu3 %v1743_v20  ;;  %v1712_v38 = vld [vmem:[#allocation6 + $0x1b0] sm:$0xf0]  ;;  %v1944_v8 = vld [vmem:[#allocation6 + $0x64] sm:$0xf]  ;;  %v1974_v12 = vld [vmem:[#allocation6 + $0x14c] sm:$0xf0] }
  0x41   :  { %v1715_v48 = vor.u32 %v1984_v37, %v1712_v38  ;;  %877 = vmatpush.bf16.msrb.mxu2 %v1599_v41  ;;  %v1552_v9 = vld [vmem:[#allocation6 + $0x70] sm:$0xf0]  ;;  %v1972_v14 = vld [vmem:[#allocation6 + $0x144] sm:$0xf]  ;;  %v1534_v18 = vld [vmem:[#allocation6 + $0x40] sm:$0xf]  ;;  %v1663_v19 = vor.u32 %v1974_v12, %v1662_v11 }
  0x42   :  { %v1664_v15 = vld [vmem:[#allocation6 + $0x150] sm:$0xf0]  ;;  %v1555_v17 = vor.u32 %v1944_v8, %v1552_v9  ;;  %v1942_v20 = vld [vmem:[#allocation6 + $0x4c] sm:$0xf0]  ;;  %v1940_v21 = vld [vmem:[#allocation6 + $0x44] sm:$0xf] }
  0x43   :  { %455 = vmatpush.bf16.msrb.mxu0 %v1411_v43  ;;  %v1600_v43 = vld [vmem:[#allocation6 + $0xd0] sm:$0xf0]  ;;  %v1646_v25 = vld [vmem:[#allocation6 + $0x120] sm:$0xf]  ;;  %v1970_v26 = vld [vmem:[#allocation6 + $0x12c] sm:$0xf0]  ;;  %v1535_v30 = vor.u32 %v1942_v20, %v1534_v18 }
  0x44   :  { %468 = vmatpush.bf16.msrb.mxu1 %v1475_v44  ;;  %890 = vmatpush.bf16.msrb.mxu3 %v1727_v28  ;;  %v1711_v44 = vor.u32 %v1986_v36, %v1710_v35  ;;  %v1603_v45 = vor.u32 %v1956_v42, %v1600_v43  ;;  %v1536_v22 = vld [vmem:[#allocation6 + $0x50] sm:$0xf0]  ;;  %v1968_v28 = vld [vmem:[#allocation6 + $0x124] sm:$0xf]  ;;  %v1647_v33 = vor.u32 %v1970_v26, %v1646_v25  ;;  %v1966_v35 = vld [vmem:[#allocation6 + $0x10c] sm:$0xf0] }
  0x45   :  { %v1648_v29 = vld [vmem:[#allocation6 + $0x130] sm:$0xf0]  ;;  %v1539_v31 = vor.u32 %v1940_v21, %v1536_v22  ;;  %v1964_v39 = vld [vmem:[#allocation6 + $0x104] sm:$0xf]  ;;  %v1750_v41 = vld [vmem:[#allocation6 + $0x1e8] sm:$0xf] }
  0x46   :  { %v1651_v38 = vor.u32 %v1968_v28, %v1648_v29  ;;  %v1632_v40 = vld [vmem:[#allocation6 + $0x110] sm:$0xf0]  ;;  %v1995_v43 = vld [vmem:[#allocation6 + $0x1f4] sm:$0xf0]  ;;  %v1518_v47 = vld [vmem:[#allocation6 + $0x20] sm:$0xf] }
  0x47   :  { %456 = vmatpush.bf16.msrb.mxu0 %v1403_v49  ;;  %v1582_v49 = vld [vmem:[#allocation6 + $0xa0] sm:$0xf]  ;;  %v1991_v59 = vld [vmem:[#allocation6 + $0x1d4] sm:$0xf0]  ;;  %v1736_v63 = vld [vmem:[#allocation6 + $0x1d8] sm:$0xf0] }
  0x48   :  { %469 = vmatpush.bf16.msrb.mxu1 %v1467_v50  ;;  %v1954_v50 = vld [vmem:[#allocation6 + $0xac] sm:$0xf0]  ;;  %891 = vmatpush.bf16.msrb.mxu3 %v1711_v44  ;;  %v1993_v44 = vld [vmem:[#allocation6 + $0x1ec] sm:$0xf]  ;;  %v1502_v0 = vld [vmem:[#allocation6] sm:$0xf] }
  0x49   :  { %v1963_v11 = vld [vmem:[#allocation6 + $0xf4] sm:$0xf0]  ;;  %v1961_v12 = vld [vmem:[#allocation6 + $0xec] sm:$0xf]  ;;  %v1720_v20 = vld [vmem:[#allocation6 + $0x1b8] sm:$0xf0] }
  0x4a   :  { %v1985_v18 = vld [vmem:[#allocation6 + $0x1ac] sm:$0xf]  ;;  %v1606_v22 = vld [vmem:[#allocation6 + $0xc8] sm:$0xf]  ;;  %v1608_v26 = vld [vmem:[#allocation6 + $0xd8] sm:$0xf0] }
  0x4b   :  { %457 = vmatpush.bf16.msrb.mxu0 %v1395_v55  ;;  %v1583_v55 = vor.u32 %v1954_v50, %v1582_v49  ;;  %v1936_v50 = vld [vmem:[#allocation6 + $0x24] sm:$0xf]  ;;  %v1723_v21 = vor.u32 %v1985_v18, %v1720_v20  ;;  %v1702_v28 = vld [vmem:[#allocation6 + $0x188] sm:$0xf]  ;;  %v1983_v29 = vld [vmem:[#allocation6 + $0x194] sm:$0xf0] }
  0x4c   :  { %470 = vmatpush.bf16.msrb.mxu1 %v1459_v56  ;;  %v1587_v56 = vor.u32 %v1952_v51, %v1584_v54  ;;  %892 = vmatpush.bf16.msrb.mxu3 %v1695_v58  ;;  %v1520_v51 = vld [vmem:[#allocation6 + $0x30] sm:$0xf0]  ;;  %v1635_v54 = vor.u32 %v1964_v39, %v1632_v40  ;;  %v1734_v58 = vld [vmem:[#allocation6 + $0x1c8] sm:$0xf]  ;;  %v1939_v18 = vld [vmem:[#allocation6 + $0x34] sm:$0xf0] }
  0x4d   :  { %878 = vmatpush.bf16.msrb.mxu2 %v1583_v55  ;;  %v1686_v40 = vld [vmem:[#allocation6 + $0x168] sm:$0xf]  ;;  %v1937_v20 = vld [vmem:[#allocation6 + $0x2c] sm:$0xf] }
  0x4f   :  { %458 = vmatpush.bf16.msrb.mxu0 %v1387_v1  ;;  %v1976_v1 = vld [vmem:[#allocation6 + $0x164] sm:$0xf] }
  0x50   :  { %471 = vmatpush.bf16.msrb.mxu1 %v1451_v4  ;;  %v1571_v4 = vor.u32 %v1948_v60, %v1568_v61  ;;  %v1683_v10 = vor.u32 %v1976_v1, %v1680_v2  ;;  %893 = vmatpush.bf16.msrb.mxu3 %v1679_v6  ;;  %v1523_v61 = vor.u32 %v1936_v50, %v1520_v51  ;;  %v1934_v2 = vld [vmem:[#allocation6 + $0xc] sm:$0xf0]  ;;  %v1576_v50 = vld [vmem:[#allocation6 + $0x98] sm:$0xf0] }
  0x51   :  { %879 = vmatpush.bf16.msrb.mxu2 %v1567_v3  ;;  %v1932_v3 = vld [vmem:[#allocation6 + $0x4] sm:$0xf]  ;;  %v1735_v6 = vor.u32 %v1991_v59, %v1734_v58  ;;  %v1503_v8 = vor.u32 %v1934_v2, %v1502_v0  ;;  %v1558_v58 = vld [vmem:[#allocation6 + $0x68] sm:$0xf]  ;;  %v1947_v59 = vld [vmem:[#allocation6 + $0x74] sm:$0xf0] }
  0x52   :  { %v1971_v0 = vld [vmem:[#allocation6 + $0x134] sm:$0xf0] }
  0x53   :  { %459 = vmatpush.bf16.msrb.mxu0 %v1379_v13  ;;  %v112_v13 = vld [vmem:[%s2233_s2] sm:$0x3] }
  0x54   :  { %472 = vmatpush.bf16.msrb.mxu1 %v1443_v16  ;;  %v1551_v16 = vor.u32 %v1946_v7, %v1550_v5  ;;  %v114_v23 = vperm.slane %v112_v13, 0  ;;  %v115_v27 = vperm.slane %v112_v13, 1  ;;  %894 = vmatpush.bf16.msrb.mxu3 %v1663_v19 }
  0x56   :  { %880 = vmatpush.bf16.msrb.mxu2 %v1551_v16  ;;  %v1718_v16 = vld [vmem:[#allocation6 + $0x1a8] sm:$0xf] }
  0x57   :  { %902 = vmatpush.bf16.msra.mxu0 %v1619_v34  ;;  %v1630_v34 = vld [vmem:[#allocation6 + $0x100] sm:$0xf] }
  0x58   :  { %915 = vmatpush.bf16.msra.mxu1 %v1747_v24  ;;  %v1667_v24 = vor.u32 %v1972_v14, %v1664_v15  ;;  %895 = vmatpush.bf16.msrb.mxu3 %v1647_v33  ;;  %v1631_v53 = vor.u32 %v1966_v35, %v1630_v34  ;;  %v1624_v14 = vld [vmem:[#allocation6 + $0xf8] sm:$0xf0]  ;;  %v1590_v34 = vld [vmem:[#allocation6 + $0xa8] sm:$0xf]  ;;  %v1955_v35 = vld [vmem:[#allocation6 + $0xb4] sm:$0xf0] }
  0x59   :  { %v1627_v15 = vor.u32 %v1961_v12, %v1624_v14  ;;  %v1638_v12 = vld [vmem:[#allocation6 + $0x108] sm:$0xf]  ;;  %v1965_v14 = vld [vmem:[#allocation6 + $0x10c] sm:$0xf] }
  0x5a   :  { %881 = vmatpush.bf16.msrb.mxu2 %v1535_v30  ;;  %v1981_v30 = vld [vmem:[#allocation6 + $0x18c] sm:$0xf] }
  0x5b   :  { %903 = vmatpush.bf16.msra.mxu0 %v1603_v45  ;;  %v1752_v45 = vld [vmem:[#allocation6 + $0x1f8] sm:$0xf0] }
  0x5c   :  { %916 = vmatpush.bf16.msra.mxu1 %v1731_v32  ;;  %v1755_v57 = vor.u32 %v1993_v44, %v1752_v45  ;;  %896 = vmatpush.bf16.msrb.mxu3 %v1631_v53  ;;  %v1688_v44 = vld [vmem:[#allocation6 + $0x178] sm:$0xf0]  ;;  %v1975_v53 = vld [vmem:[#allocation6 + $0x154] sm:$0xf0] }
  0x5f   :  { %904 = vmatpush.bf16.msra.mxu0 %v1587_v56  ;;  %v1751_v56 = vor.u32 %v1995_v43, %v1750_v41  ;;  %v1979_v41 = vld [vmem:[#allocation6 + $0x174] sm:$0xf0] }
  0x60   :  { %917 = vmatpush.bf16.msra.mxu1 %v1715_v48  ;;  %v1938_v48 = vld [vmem:[#allocation6 + $0x2c] sm:$0xf0]  ;;  %v1687_v43 = vor.u32 %v1979_v41, %v1686_v40 }
  0x61   :  { %v1519_v60 = vor.u32 %v1938_v48, %v1518_v47  ;;  %v1951_v47 = vld [vmem:[#allocation6 + $0x94] sm:$0xf0]  ;;  %v1949_v48 = vld [vmem:[#allocation6 + $0x8c] sm:$0xf] }
  0x62   :  { %v1579_v51 = vor.u32 %v1949_v48, %v1576_v50  ;;  %v2003_v48 = vld [vmem:[#allocation7 + $0x38] sm:$0xff] }
  0x63   :  { %905 = vmatpush.bf16.msra.mxu0 %v1571_v4  ;;  %v1504_v4 = vld [vmem:[#allocation6 + $0x10] sm:$0xf0]  ;;  %882 = vmatpush.bf16.msrb.mxu2 %v1519_v60  ;;  %v1945_v60 = vld [vmem:[#allocation6 + $0x6c] sm:$0xf] }
  0x64   :  { %918 = vmatpush.bf16.msra.mxu1 %v1699_v62  ;;  %v1989_v62 = vld [vmem:[#allocation6 + $0x1cc] sm:$0xf]  ;;  %v1507_v9 = vor.u32 %v1932_v3, %v1504_v4  ;;  %v1656_v4 = vld [vmem:[#allocation6 + $0x138] sm:$0xf0] }
  0x65   :  { %v1739_v7 = vor.u32 %v1989_v62, %v1736_v63  ;;  %v1560_v62 = vld [vmem:[#allocation6 + $0x78] sm:$0xf0]  ;;  %v1654_v63 = vld [vmem:[#allocation6 + $0x128] sm:$0xf]  ;;  %v1969_v3 = vld [vmem:[#allocation6 + $0x12c] sm:$0xf] }
  0x66   :  { %v1655_v2 = vor.u32 %v1971_v0, %v1654_v63  ;;  %v2005_v63 = vld [vmem:[#allocation7 + $0x48] sm:$0xff] }
  0x67   :  { %906 = vmatpush.bf16.msra.mxu0 %v1555_v17  ;;  %883 = vmatpush.bf16.msrb.mxu2 %v1503_v8  ;;  %v1987_v17 = vld [vmem:[#allocation6 + $0x1b4] sm:$0xf0]  ;;  %v1941_v8 = vld [vmem:[#allocation6 + $0x4c] sm:$0xf] }
  0x68   :  { %919 = vmatpush.bf16.msra.mxu1 %v1683_v10  ;;  %v1622_v10 = vld [vmem:[#allocation6 + $0xe8] sm:$0xf]  ;;  %v1719_v19 = vor.u32 %v1987_v17, %v1718_v16  ;;  %v1640_v16 = vld [vmem:[#allocation6 + $0x118] sm:$0xf0] }
  0x69   :  { %v1623_v13 = vor.u32 %v1963_v11, %v1622_v10  ;;  %v1526_v17 = vld [vmem:[#allocation6 + $0x28] sm:$0xf] }
  0x6a   :  { %v2025_v0 = vld [vmem:[#allocation7 + $0xe8] sm:$0xff] }
  0x6b   :  { %907 = vmatpush.bf16.msra.mxu0 %v1539_v31  ;;  %v1703_v31 = vor.u32 %v1983_v29, %v1702_v28  ;;  %v1512_v29 = vld [vmem:[#allocation6 + $0x18] sm:$0xf0] }
  0x6c   :  { %920 = vmatpush.bf16.msra.mxu1 %v1667_v24  ;;  %v1957_v24 = vld [vmem:[#allocation6 + $0xcc] sm:$0xf] }
  0x6f   :  { %908 = vmatpush.bf16.msra.mxu0 %v1523_v61  ;;  %v1559_v61 = vor.u32 %v1947_v59, %v1558_v58  ;;  %v2000_v58 = vld [vmem:[#allocation7 + $0x20] sm:$0xff]  ;;  %v2006_v59 = vld [vmem:[#allocation7 + $0x50] sm:$0xff] }
  0x70   :  { %921 = vmatpush.bf16.msra.mxu1 %v1651_v38  ;;  %v1592_v38 = vld [vmem:[#allocation6 + $0xb8] sm:$0xf0] }
  0x73   :  { %909 = vmatpush.bf16.msra.mxu0 %v1507_v9  ;;  %v1544_v9 = vld [vmem:[#allocation6 + $0x58] sm:$0xf0] }
  0x74   :  { %922 = vmatpush.bf16.msra.mxu1 %v1635_v54  ;;  %v1973_v54 = vld [vmem:[#allocation6 + $0x14c] sm:$0xf]  ;;  %v1547_v11 = vor.u32 %v1941_v8, %v1544_v9  ;;  %v1996_v8 = vld [vmem:[#allocation7] sm:$0xff] }
  0x75   :  { %v2016_v9 = vld [vmem:[#allocation7 + $0xa0] sm:$0xff] }
  0xb3   :  { %v207_v32 = vpop.f32.mrf.mxu0 }
  0xb4   :  { %v208_v36 = vadd.f32 %v207_v32, %v114_v23  ;;  %v220_v37 = vpop.f32.mrf.mxu1  ;;  %v1959_v23 = vld [vmem:[#allocation6 + $0xd4] sm:$0xf0]  ;;  %v1704_v32 = vld [vmem:[#allocation6 + $0x198] sm:$0xf0] }
  0xb5   :  { %v221_v42 = vadd.f32 %v220_v37, %v115_v27  ;;  %v1607_v25 = vor.u32 %v1959_v23, %v1606_v22  ;;  %v1611_v27 = vor.u32 %v1957_v24, %v1608_v26  ;;  %v1707_v33 = vor.u32 %v1981_v30, %v1704_v32  ;;  %v1953_v37 = vld [vmem:[#allocation6 + $0xac] sm:$0xf]  ;;  %v1510_v24 = vld [vmem:[#allocation6 + $0x8] sm:$0xf] }
  0xb6   :  { %v224_v46 = vmax.f32 %v208_v36, 0.0  ;;  %v1591_v36 = vor.u32 %v1955_v35, %v1590_v34  ;;  %v1595_v39 = vor.u32 %v1953_v37, %v1592_v38  ;;  %v1527_v22 = vor.u32 %v1939_v18, %v1526_v17  ;;  %v1933_v26 = vld [vmem:[#allocation6 + $0xc] sm:$0xf]  ;;  %v546_v17 = vld [vmem:[%s2237_s6] sm:$0xf] }
  0xb7   :  { %v225_v49 = vmax.f32 %v221_v42, 0.0  ;;  %v1977_v42 = vld [vmem:[#allocation6 + $0x16c] sm:$0xf]  ;;  %v1515_v30 = vor.u32 %v1933_v26, %v1512_v29  ;;  %v2012_v18 = vld [vmem:[#allocation7 + $0x80] sm:$0xff] }
  0xb8   :  { %v226_v52 = vpack.c.bf16 %v224_v46, %v224_v46  ;;  %v1691_v45 = vor.u32 %v1977_v42, %v1688_v44  ;;  %v1574_v46 = vld [vmem:[#allocation6 + $0x88] sm:$0xf] }
  0xb9   :  { %v227_v55 = vpack.c.bf16 %v225_v49, %v225_v49  ;;  %v1575_v49 = vor.u32 %v1951_v47, %v1574_v46  ;;  %v2010_v46 = vld [vmem:[#allocation7 + $0x70] sm:$0xff] }
  0xba   :  { %434 = vmatmul.bf16.vlgmr.msra.gmra.mxu2 %v226_v52  ;;  %460 = vmatmul.bf16.vlgmr.msrb.gmra.mxu0 %v226_v52  ;;  %v1670_v52 = vld [vmem:[#allocation6 + $0x148] sm:$0xf] }
  0xbb   :  { %447 = vmatmul.bf16.vlgmr.msra.gmra.mxu3 %v227_v55  ;;  %473 = vmatmul.bf16.vlgmr.msrb.gmra.mxu1 %v227_v55  ;;  %v209_v1 = vpop.f32.mrf.mxu0  ;;  %v1671_v55 = vor.u32 %v1975_v53, %v1670_v52  ;;  %v2002_v53 = vld [vmem:[#allocation7 + $0x30] sm:$0xff] }
  0xbc   :  { %v222_v5 = vpop.f32.mrf.mxu1  ;;  %941 = vmatpush.bf16.msra.mxu3 %v1751_v56  ;;  %967 = vmatpush.bf16.msrb.mxu1 %v1755_v57  ;;  %v1672_v56 = vld [vmem:[#allocation6 + $0x158] sm:$0xf0]  ;;  %v1563_v1 = vor.u32 %v1945_v60, %v1560_v62  ;;  %v2026_v60 = vld [vmem:[#allocation7 + $0xf0] sm:$0xff] }
  0xbd   :  { %928 = vmatpush.bf16.msra.mxu2 %v1623_v13  ;;  %954 = vmatpush.bf16.msrb.mxu0 %v1627_v15  ;;  %v1675_v57 = vor.u32 %v1973_v54, %v1672_v56  ;;  %v1542_v5 = vld [vmem:[#allocation6 + $0x48] sm:$0xf]  ;;  %v1967_v13 = vld [vmem:[#allocation6 + $0x114] sm:$0xf0]  ;;  %v2008_v54 = vld [vmem:[#allocation7 + $0x60] sm:$0xff] }
  0xbe   :  { %v1639_v15 = vor.u32 %v1967_v13, %v1638_v12  ;;  %v2007_v56 = vld [vmem:[#allocation7 + $0x58] sm:$0xff]  ;;  %v2021_v12 = vld [vmem:[#allocation7 + $0xc8] sm:$0xff]  ;;  %v2014_v13 = vld [vmem:[#allocation7 + $0x90] sm:$0xff] }
  0xbf   :  { %v2019_v62 = vld [vmem:[#allocation7 + $0xb8] sm:$0xff] }
  0xc0   :  { %942 = vmatpush.bf16.msra.mxu3 %v1735_v6  ;;  %968 = vmatpush.bf16.msrb.mxu1 %v1739_v7  ;;  %v1659_v6 = vor.u32 %v1969_v3, %v1656_v4  ;;  %v1943_v7 = vld [vmem:[#allocation6 + $0x54] sm:$0xf0]  ;;  %v2004_v3 = vld [vmem:[#allocation7 + $0x40] sm:$0xff] }
  0xc1   :  { %929 = vmatpush.bf16.msra.mxu2 %v1607_v25  ;;  %955 = vmatpush.bf16.msrb.mxu0 %v1611_v27  ;;  %v1543_v10 = vor.u32 %v1943_v7, %v1542_v5  ;;  %v1935_v25 = vld [vmem:[#allocation6 + $0x14] sm:$0xf0]  ;;  %v260_v27 = vld [vmem:[%s2235_s4] sm:$0x3]  ;;  %v1997_v5 = vld [vmem:[#allocation7 + $0x8] sm:$0xff] }
  0xc2   :  { %v1511_v28 = vor.u32 %v1935_v25, %v1510_v24  ;;  %v2024_v4 = vld [vmem:[#allocation7 + $0xe0] sm:$0xff]  ;;  %v2023_v7 = vld [vmem:[#allocation7 + $0xd8] sm:$0xff]  ;;  %v548_v25 = vperm.slane %v546_v17, 0 }
  0xc4   :  { %943 = vmatpush.bf16.msra.mxu3 %v1719_v19  ;;  %969 = vmatpush.bf16.msrb.mxu1 %v1723_v21  ;;  %v1643_v19 = vor.u32 %v1965_v14, %v1640_v16  ;;  %v1528_v21 = vld [vmem:[#allocation6 + $0x38] sm:$0xf0]  ;;  %v2020_v14 = vld [vmem:[#allocation7 + $0xc0] sm:$0xff] }
  0xc5   :  { %930 = vmatpush.bf16.msra.mxu2 %v1591_v36  ;;  %956 = vmatpush.bf16.msrb.mxu0 %v1595_v39  ;;  %v1531_v23 = vor.u32 %v1937_v20, %v1528_v21  ;;  %v262_v36 = vperm.slane %v260_v27, 0  ;;  %v2011_v39 = vld [vmem:[#allocation7 + $0x78] sm:$0xff] }
  0xc8   :  { %944 = vmatpush.bf16.msra.mxu3 %v1703_v31  ;;  %970 = vmatpush.bf16.msrb.mxu1 %v1707_v33  ;;  %v263_v31 = vperm.slane %v260_v27, 1 }
  0xc9   :  { %931 = vmatpush.bf16.msra.mxu2 %v1575_v49  ;;  %957 = vmatpush.bf16.msrb.mxu0 %v1579_v51  ;;  %v2009_v51 = vld [vmem:[#allocation7 + $0x68] sm:$0xff] }
  0xcc   :  { %945 = vmatpush.bf16.msra.mxu3 %v1687_v43  ;;  %971 = vmatpush.bf16.msrb.mxu1 %v1691_v45 }
  0xcd   :  { %932 = vmatpush.bf16.msra.mxu2 %v1559_v61  ;;  %958 = vmatpush.bf16.msrb.mxu0 %v1563_v1  ;;  %v1999_v61 = vld [vmem:[#allocation7 + $0x18] sm:$0xff]  ;;  %v1998_v1 = vld [vmem:[#allocation7 + $0x10] sm:$0xff] }
  0xd0   :  { %946 = vmatpush.bf16.msra.mxu3 %v1671_v55  ;;  %972 = vmatpush.bf16.msrb.mxu1 %v1675_v57  ;;  %v2001_v55 = vld [vmem:[#allocation7 + $0x28] sm:$0xff]  ;;  %v2027_v57 = vld [vmem:[#allocation7 + $0xf8] sm:$0xff] }
  0xd1   :  { %933 = vmatpush.bf16.msra.mxu2 %v1543_v10  ;;  %959 = vmatpush.bf16.msrb.mxu0 %v1547_v11  ;;  %v2022_v10 = vld [vmem:[#allocation7 + $0xd0] sm:$0xff]  ;;  %v2015_v11 = vld [vmem:[#allocation7 + $0x98] sm:$0xff] }
  0xd4   :  { %947 = vmatpush.bf16.msra.mxu3 %v1655_v2  ;;  %973 = vmatpush.bf16.msrb.mxu1 %v1659_v6  ;;  %v2018_v2 = vld [vmem:[#allocation7 + $0xb0] sm:$0xff]  ;;  %v2017_v6 = vld [vmem:[#allocation7 + $0xa8] sm:$0xff] }
  0xd5   :  { %934 = vmatpush.bf16.msra.mxu2 %v1527_v22  ;;  %960 = vmatpush.bf16.msrb.mxu0 %v1531_v23 }
  0xd8   :  { %948 = vmatpush.bf16.msra.mxu3 %v1639_v15  ;;  %974 = vmatpush.bf16.msrb.mxu1 %v1643_v19  ;;  %v2013_v15 = vld [vmem:[#allocation7 + $0x88] sm:$0xff]  ;;  %v549_v19 = vperm.slane %v546_v17, 1 }
  0xd9   :  { %935 = vmatpush.bf16.msra.mxu2 %v1511_v28  ;;  %961 = vmatpush.bf16.msrb.mxu0 %v1515_v30 }
 0x137   :  { %v461_v32 = vpop.f32.mrf.mxu0 }
 0x138   :  { %v462_v33 = vadd.f32 %v461_v32, %v263_v31  ;;  %v474_v34 = vpop.f32.mrf.mxu1 }
 0x13a   :  { %v475_v35 = vadd.f32 %v474_v34, %v462_v33 }
 0x13c   :  { %v479_v37 = vmax.f32 %v475_v35, 0.0 }
 0x13d   :  { %v435_v38 = vpop.f32.mrf.mxu2 }
 0x13e   :  { %v481_v40 = vpack.c.bf16 %v479_v37, %v479_v37  ;;  %v436_v41 = vadd.f32 %v435_v38, %v262_v36  ;;  %v448_v42 = vpop.f32.mrf.mxu3  ;;  %v551_v36 = vperm.slane %v546_v17, 3 }
 0x13f   :  { %v463_v43 = vpop.f32.mrf.mxu0 }
 0x140   :  { %v449_v44 = vadd.f32 %v448_v42, %v436_v41  ;;  %v476_v45 = vpop.f32.mrf.mxu1  ;;  %897 = vmatmul.bf16.vlgmr.msrb.gmra.mxu3 %v481_v40  ;;  %923 = vmatmul.bf16.vlgmr.msra.gmra.mxu1 %v481_v40  ;;  %v550_v43 = vperm.slane %v546_v17, 2 }
 0x141   :  { %1261 = vmatpush.bf16.msrb.mxu3 %v2011_v39  ;;  %1287 = vmatpush.bf16.msra.mxu1 %v2027_v57 }
 0x142   :  { %v478_v47 = vmax.f32 %v449_v44, 0.0 }
 0x144   :  { %v480_v49 = vpack.c.bf16 %v478_v47, %v478_v47 }
 0x145   :  { %v437_v50 = vpop.f32.mrf.mxu2  ;;  %1262 = vmatpush.bf16.msrb.mxu3 %v2010_v46  ;;  %1288 = vmatpush.bf16.msra.mxu1 %v2026_v60 }
 0x146   :  { %v450_v52 = vpop.f32.mrf.mxu3  ;;  %884 = vmatmul.bf16.vlgmr.msrb.gmra.mxu2 %v480_v49  ;;  %910 = vmatmul.bf16.vlgmr.msra.gmra.mxu0 %v480_v49 }
 0x147   :  { %1248 = vmatpush.bf16.msrb.mxu2 %v2003_v48  ;;  %1274 = vmatpush.bf16.msra.mxu0 %v2019_v62 }
 0x149   :  { %1263 = vmatpush.bf16.msrb.mxu3 %v2009_v51  ;;  %1289 = vmatpush.bf16.msra.mxu1 %v2025_v0 }
 0x14b   :  { %1249 = vmatpush.bf16.msrb.mxu2 %v2002_v53  ;;  %1275 = vmatpush.bf16.msra.mxu0 %v2018_v2 }
 0x14d   :  { %1264 = vmatpush.bf16.msrb.mxu3 %v2008_v54  ;;  %1290 = vmatpush.bf16.msra.mxu1 %v2024_v4 }
 0x14f   :  { %1250 = vmatpush.bf16.msrb.mxu2 %v2001_v55  ;;  %1276 = vmatpush.bf16.msra.mxu0 %v2017_v6 }
 0x150   :  { %949 = vmatmul.bf16.vlgmr.msra.gmra.mxu3 %v481_v40  ;;  %975 = vmatmul.bf16.vlgmr.msrb.gmra.mxu1 %v481_v40 }
 0x151   :  { %1265 = vmatpush.bf16.msrb.mxu3 %v2007_v56  ;;  %1291 = vmatpush.bf16.msra.mxu1 %v2023_v7  ;;  %v2038_v56 = vld [vmem:[%s2239_s8] ss:$0 sm:$0xff] }
 0x153   :  { %1251 = vmatpush.bf16.msrb.mxu2 %v2000_v58  ;;  %1277 = vmatpush.bf16.msra.mxu0 %v2016_v9 }
 0x155   :  { %1266 = vmatpush.bf16.msrb.mxu3 %v2006_v59  ;;  %1292 = vmatpush.bf16.msra.mxu1 %v2022_v10 }
 0x156   :  { %936 = vmatmul.bf16.vlgmr.msra.gmra.mxu2 %v480_v49  ;;  %962 = vmatmul.bf16.vlgmr.msrb.gmra.mxu0 %v480_v49 }
 0x157   :  { %1252 = vmatpush.bf16.msrb.mxu2 %v1999_v61  ;;  %1278 = vmatpush.bf16.msra.mxu0 %v2015_v11 }
 0x159   :  { %1267 = vmatpush.bf16.msrb.mxu3 %v2005_v63  ;;  %1293 = vmatpush.bf16.msra.mxu1 %v2021_v12 }
 0x15b   :  { %1253 = vmatpush.bf16.msrb.mxu2 %v1998_v1  ;;  %1279 = vmatpush.bf16.msra.mxu0 %v2014_v13 }
 0x15d   :  { %1268 = vmatpush.bf16.msrb.mxu3 %v2004_v3  ;;  %1294 = vmatpush.bf16.msra.mxu1 %v2020_v14 }
 0x15f   :  { %1254 = vmatpush.bf16.msrb.mxu2 %v1997_v5  ;;  %1280 = vmatpush.bf16.msra.mxu0 %v2013_v15 }
 0x163   :  { %1255 = vmatpush.bf16.msrb.mxu2 %v1996_v8  ;;  %1281 = vmatpush.bf16.msra.mxu0 %v2012_v18 }
 0x1bd   :  { %v924_v16 = vpop.f32.mrf.mxu1 }
 0x1c3   :  { %v898_v20 = vpop.f32.mrf.mxu3  ;;  %v911_v21 = vpop.f32.mrf.mxu0 }
 0x1c4   :  { %v912_v22 = vadd.f32 %v911_v21, %v549_v19 }
 0x1c5   :  { %v926_v23 = vpop.f32.mrf.mxu1 }
 0x1c6   :  { %v925_v24 = vadd.f32 %v924_v16, %v912_v22 }
 0x1c8   :  { %v981_v26 = vmax.f32 %v925_v24, 0.0 }
 0x1c9   :  { %v885_v27 = vpop.f32.mrf.mxu2 }
 0x1ca   :  { %v985_v28 = vpack.c.bf16 %v981_v26, %v981_v26  ;;  %v886_v29 = vadd.f32 %v885_v27, %v548_v25 }
 0x1cb   :  { %v900_v30 = vpop.f32.mrf.mxu3  ;;  %v913_v31 = vpop.f32.mrf.mxu0 }
 0x1cc   :  { %v899_v32 = vadd.f32 %v898_v20, %v886_v29  ;;  %1269 = vmatmul.bf16.vlgmr.msrb.gmra.mxu3 %v985_v28 }
 0x1cd   :  { %v976_v33 = vpop.f32.mrf.mxu1 }
 0x1ce   :  { %v980_v34 = vmax.f32 %v899_v32, 0.0 }
 0x1d0   :  { %v984_v35 = vpack.c.bf16 %v980_v34, %v980_v34 }
 0x1d1   :  { %v887_v37 = vpop.f32.mrf.mxu2 }
 0x1d2   :  { %1256 = vmatmul.bf16.vlgmr.msrb.gmra.mxu2 %v984_v35 }
 0x1d3   :  { %v950_v38 = vpop.f32.mrf.mxu3  ;;  %v963_v39 = vpop.f32.mrf.mxu0 }
 0x1d4   :  { %v964_v40 = vadd.f32 %v963_v39, %v551_v36 }
 0x1d5   :  { %v978_v41 = vpop.f32.mrf.mxu1 }
 0x1d6   :  { %v977_v42 = vadd.f32 %v976_v33, %v964_v40 }
 0x1d8   :  { %v983_v44 = vmax.f32 %v977_v42, 0.0 }
 0x1d9   :  { %v937_v45 = vpop.f32.mrf.mxu2 }
 0x1da   :  { %v987_v46 = vpack.c.bf16 %v983_v44, %v983_v44  ;;  %v938_v47 = vadd.f32 %v937_v45, %v550_v43 }
 0x1db   :  { %v952_v48 = vpop.f32.mrf.mxu3  ;;  %v965_v49 = vpop.f32.mrf.mxu0 }
 0x1dc   :  { %v951_v50 = vadd.f32 %v950_v38, %v938_v47  ;;  %1295 = vmatmul.bf16.vlgmr.msra.gmra.mxu1 %v987_v46 }
 0x1de   :  { %v982_v51 = vmax.f32 %v951_v50, 0.0 }
 0x1e0   :  { %v986_v52 = vpack.c.bf16 %v982_v51, %v982_v51 }
 0x1e1   :  { %v939_v53 = vpop.f32.mrf.mxu2 }
 0x1e2   :  { %1282 = vmatmul.bf16.vlgmr.msra.gmra.mxu0 %v986_v52 }
 0x24f   :  { %v1270_v54 = vpop.f32.mrf.mxu3 }
 0x255   :  { %v1257_v55 = vpop.f32.mrf.mxu2 }
 0x256   :  { %v1258_v59 = vadd.f32 %v2038_v56, %v1257_v55 }
 0x257   :  { %v1272_v57 = vpop.f32.mrf.mxu3 }
 0x258   :  { %v1271_v61 = vadd.f32 %v1270_v54, %v1258_v59 }
 0x259   :  { %v1296_v58 = vpop.f32.mrf.mxu1 }
 0x25d   :  { %v1259_v60 = vpop.f32.mrf.mxu2 }
 0x25f   :  { %v1283_v62 = vpop.f32.mrf.mxu0 }
 0x260   :  { %v1284_v63 = vadd.f32 %v1283_v62, %v1271_v61 }
 0x261   :  { %v1298_v0 = vpop.f32.mrf.mxu1 }
 0x262   :  { %v1297_v1 = vadd.f32 %v1296_v58, %v1284_v63 }
 0x264   :  { %1300 = vst [vmem:[%s2240_s9] sm:$0xff] %v1297_v1 }
 0x267   :  { %v1285_v2 = vpop.f32.mrf.mxu0 }
 0x268   :  { %1305 = vsyncpa [#allocation3], 1 }
 0x269   :  { %1306 = vsyncpa [#allocation5], 1 }
 0x26a   :  { %1307 = vsyncpa [#allocation8], 1 }

</bundles_post_ra>
